<compile_context>
chip_gen: v6e
topology: v6e:2x2x1
jax: 0.10.0
libtpu: 0.0.40
codegen_flags: <defaults>
</compile_context>

<pallas_src>
import jax
import jax.numpy as jnp
import numpy as np
from jax.experimental import pallas as pl
from jax.experimental.pallas import tpu as pltpu

EPS = 1e-5


# ----------------------------------------------------------------------------
# Pallas kernel: fused BN + ReLU + AvgPool(2,2) + Conv1d(k=1)
# ----------------------------------------------------------------------------
def _transition_kernel(x_ref, w_ref, b_ref, sc_ref, sh_ref, o_ref):
    """One (batch-element, L-tile) step.

    x_ref        : (2, 1, Cin, TL) bf16   even slab at [0], odd slab at [1]
    w_ref        : (Cout, Cin)     bf16   1x1-conv weight
    b_ref        : (Cout, 1)       f32    bias
    sc_ref/sh_ref: (Cin, 1)        f32    folded BN scale/shift (x0.5 pool factor)
    o_ref        : (1, Cout, TL)   f32    pooled output tile
    """
    sc = sc_ref[...]                                   # (Cin, 1), broadcasts over lanes
    sh = sh_ref[...]

    # Upcast to f32 for BN + ReLU on the VPU (v5e has no bf16 VALU).
    xe = x_ref[0, 0].astype(jnp.float32)               # (Cin, TL)
    xo = x_ref[1, 0].astype(jnp.float32)               # (Cin, TL)
    ae = jnp.maximum(xe * sc + sh, 0.0)
    ao = jnp.maximum(xo * sc + sh, 0.0)

    # AvgPool1d(k=2,s=2) commuted ahead of the (linear) 1x1 conv; the 0.5
    # factor is already folded into sc/sh, so the pool is just an add.
    pooled = (ae + ao).astype(jnp.bfloat16)             # (Cin, TL) bf16 MXU operand

    # 1x1 conv as one matmul: K = Cin un-tiled, N = TL on lanes (lane-dense).
    y = jnp.dot(w_ref[...], pooled, preferred_element_type=jnp.float32)

    o_ref[0] = y + b_ref[...]                            # (Cout, TL) f32


# ----------------------------------------------------------------------------
# Tile / VMEM sizing helpers
# ----------------------------------------------------------------------------
def _vmem_capacity_bytes():
    """Per-core VMEM capacity; fallback to the v7x worst case (64 MiB)."""
    try:
        info = pltpu.get_tpu_info()
        return int(getattr(info, "vmem_capacity_bytes", 64 * 1024 * 1024))
    except Exception:
        return 64 * 1024 * 1024


def _pick_l_tile(lo, n, cin, cout, tile_budget_bytes):
    """Largest multiple of 128 dividing `lo` that fits the VMEM tile budget,
    while keeping at least 2 total grid steps (v7x has 2 TensorCores)."""
    # Generous per-lane-column VMEM estimate:
    #   inputs : 2 slabs x bf16 x 2 buffers
    #   output : f32 x 2 buffers
    #   temps  : ~4 f32 intermediates of (Cin, TL)
    per_lane = 2 * cin * 2 * 2 + cout * 4 * 2 + 4 * cin * 4
    fixed = cout * cin * 2 + (cout + 2 * cin) * 4       # resident weight + params
    cap = max((tile_budget_bytes - fixed) // per_lane, 128)
    cap = (cap // 128) * 128

    best = None
    t = 128
    top = min(lo, cap)
    while t <= top:
        if lo % t == 0:
            best = t
        t += 128
    if best is None:
        return lo                                        # small / irregular length

    if n * (lo // best) < 2:                             # keep both v7x cores fed
        smaller = [t for t in range(128, best, 128) if lo % t == 0]
        if smaller:
            best = smaller[-1]
    return best


# ----------------------------------------------------------------------------
# Wrapper
# ----------------------------------------------------------------------------
def transition_forward(x, scale, shift, w, b):
    """Transition forward.  x: (N, Cin, L) f32 -> (N, Cout, L//2) f32."""
    N, Cin, L = x.shape
    Cout = w.shape[0]
    Lo = L // 2            # AvgPool1d(k=2,s=2): odd trailing element dropped (PyTorch).

    # Even/odd de-interleave at the graph level, with the bf16 cast fused into
    # the strided slices so the materialized copy is half the bytes.  Stacking
    # the two slabs makes them a single kernel input (one DMA per step).
    x_even = x[:, :, 0:2 * Lo:2]                         # (N, Cin, Lo)
    x_odd = x[:, :, 1:2 * Lo:2]                          # (N, Cin, Lo)
    x_eo = jnp.stack([x_even, x_odd], axis=0).astype(jnp.bfloat16)   # (2, N, Cin, Lo)

    vmem_cap = _vmem_capacity_bytes()
    vmem_limit = int(vmem_cap * 0.75)                    # 48 MiB on v7x, 96 MiB on v5e/v6e
    tl = _pick_l_tile(Lo, N, Cin, Cout, vmem_limit // 2)
    grid = (N, pl.cdiv(Lo, tl))

    w_bf16 = w.astype(jnp.bfloat16)                      # half the weight DMA bytes
    b2 = b.reshape(Cout, 1).astype(jnp.float32)
    # Fold the 0.5 pooling factor into the BN affine (relu(0.5*z) = 0.5*relu(z)).
    sc2 = (0.5 * scale).reshape(Cin, 1).astype(jnp.float32)
    sh2 = (0.5 * shift).reshape(Cin, 1).astype(jnp.float32)

    return pl.pallas_call(
        _transition_kernel,
        out_shape=jax.ShapeDtypeStruct((N, Cout, Lo), jnp.float32),
        grid=grid,
        in_specs=[
            pl.BlockSpec((2, 1, Cin, tl), lambda n, j: (0, n, 0, j)),   # stacked even/odd
            pl.BlockSpec((Cout, Cin), lambda n, j: (0, 0)),             # VMEM-resident weight
            pl.BlockSpec((Cout, 1), lambda n, j: (0, 0)),
            pl.BlockSpec((Cin, 1), lambda n, j: (0, 0)),
            pl.BlockSpec((Cin, 1), lambda n, j: (0, 0)),
        ],
        out_specs=pl.BlockSpec((1, Cout, tl), lambda n, j: (n, 0, j)),
        compiler_params=pltpu.CompilerParams(
            dimension_semantics=("parallel", "parallel"),
            vmem_limit_bytes=vmem_limit,
        ),
    )(x_eo, w_bf16, b2, sc2, sh2)


# ----------------------------------------------------------------------------
# Parameter init (mirrors the PyTorch module's shapes, BN folded to scale/shift)
# ----------------------------------------------------------------------------
def make_transition_params(key, cin, cout):
    k = jax.random.split(key, 6)
    gamma = 1.0 + 0.1 * jax.random.normal(k[0], (cin,), jnp.float32)
    beta = 0.1 * jax.random.normal(k[1], (cin,), jnp.float32)
    mean = 0.1 * jax.random.normal(k[2], (cin,), jnp.float32)
    var = 1.0 + 0.1 * jnp.abs(jax.random.normal(k[3], (cin,), jnp.float32))
    scale = gamma / jnp.sqrt(var + EPS)
    shift = beta - mean * scale
    w = 0.1 * jax.random.normal(k[4], (cout, cin), jnp.float32)   # Conv1d k=1 weight
    b = 0.05 * jax.random.normal(k[5], (cout,), jnp.float32)
    return scale, shift, w, b


# ----------------------------------------------------------------------------
# Pure-JAX f32 reference
# ----------------------------------------------------------------------------
def transition_reference(x, scale, shift, w, b):
    a = jnp.maximum(x * scale[None, :, None] + shift[None, :, None], 0.0)
    y = jnp.einsum("oc,ncl->nol", w, a) + b[None, :, None]
    N, Co, Ly = y.shape
    Lo = Ly // 2
    return y[:, :, :2 * Lo].reshape(N, Co, Lo, 2).mean(axis=-1)


# ----------------------------------------------------------------------------
# Main
# ----------------------------------------------------------------------------
if __name__ == "__main__":
    N, CIN, COUT, L = 2, 64, 32, 768      # pooled length 384 -> one 384-lane tile per batch

    key = jax.random.PRNGKey(0)
    pkey, xkey = jax.random.split(key)
    scale, shift, w, b = make_transition_params(pkey, CIN, COUT)
    x = jax.random.normal(xkey, (N, CIN, L), jnp.float32)   # PyTorch NCL input

    out = jax.block_until_ready(transition_forward(x, scale, shift, w, b))
    ref = jax.block_until_ready(transition_reference(x, scale, shift, w, b))

    assert out.shape == (N, COUT, L // 2), out.shape
    # Tolerance accounts for bf16 activation streaming + bf16 MXU operands
    # (f32 accumulation) vs the pure-f32 reference.
    np.testing.assert_allclose(np.asarray(out), np.asarray(ref), rtol=5e-2, atol=5e-2)

    print("KERNEL_OK")
</pallas_src>

<mosaic_0001>
module attributes {stable_mosaic.version = 11 : i64} {
  func.func @_transition_kernel(%arg0: i32, %arg1: i32, %arg2: memref<2x1x64x384xbf16, #tpu.memory_space<vmem>>, %arg3: memref<32x64xbf16, #tpu.memory_space<vmem>>, %arg4: memref<32x1xf32, #tpu.memory_space<vmem>>, %arg5: memref<64x1xf32, #tpu.memory_space<vmem>>, %arg6: memref<64x1xf32, #tpu.memory_space<vmem>>, %arg7: memref<1x32x384xf32, #tpu.memory_space<vmem>>) attributes {dimension_semantics = [#tpu.dimension_semantics<parallel>, #tpu.dimension_semantics<parallel>], iteration_bounds = array<i64: 2, 1>, scalar_prefetch = 0 : i64, scratch_operands = 0 : i64, tpu.core_type = #tpu.core_type<tc>, window_params = [{transform_indices = @transform_0, window_bounds = array<i64: 2, 1, 64, 384>}, {pipeline_mode = #tpu.pipeline_mode<synchronous>, transform_indices = @transform_1, window_bounds = array<i64: 32, 64>}, {pipeline_mode = #tpu.pipeline_mode<synchronous>, transform_indices = @transform_2, window_bounds = array<i64: 32, 1>}, {pipeline_mode = #tpu.pipeline_mode<synchronous>, transform_indices = @transform_3, window_bounds = array<i64: 64, 1>}, {pipeline_mode = #tpu.pipeline_mode<synchronous>, transform_indices = @transform_4, window_bounds = array<i64: 64, 1>}, {transform_indices = @transform_5, window_bounds = array<i64: 1, 32, 384>}]} {
    %c0 = arith.constant 0 : index
    %c0_0 = arith.constant 0 : index
    %0 = vector.load %arg5[%c0, %c0_0] : memref<64x1xf32, #tpu.memory_space<vmem>>, vector<64x1xf32>
    %c0_1 = arith.constant 0 : index
    %c0_2 = arith.constant 0 : index
    %1 = vector.load %arg6[%c0_1, %c0_2] : memref<64x1xf32, #tpu.memory_space<vmem>>, vector<64x1xf32>
    %c0_3 = arith.constant 0 : index
    %c0_4 = arith.constant 0 : index
    %c0_5 = arith.constant 0 : index
    %c0_6 = arith.constant 0 : index
    %2 = vector.load %arg2[%c0_3, %c0_4, %c0_5, %c0_6] : memref<2x1x64x384xbf16, #tpu.memory_space<vmem>>, vector<1x1x64x384xbf16>
    %3 = vector.shape_cast %2 : vector<1x1x64x384xbf16> to vector<64x384xbf16>
    %4 = arith.extf %3 : vector<64x384xbf16> to vector<64x384xf32>
    %c1 = arith.constant 1 : index
    %c0_7 = arith.constant 0 : index
    %c0_8 = arith.constant 0 : index
    %c0_9 = arith.constant 0 : index
    %5 = vector.load %arg2[%c1, %c0_7, %c0_8, %c0_9] : memref<2x1x64x384xbf16, #tpu.memory_space<vmem>>, vector<1x1x64x384xbf16>
    %6 = vector.shape_cast %5 : vector<1x1x64x384xbf16> to vector<64x384xbf16>
    %7 = arith.extf %6 : vector<64x384xbf16> to vector<64x384xf32>
    %8 = vector.broadcast %0 : vector<64x1xf32> to vector<64x384xf32>
    %9 = arith.mulf %4, %8 : vector<64x384xf32>
    %10 = vector.broadcast %1 : vector<64x1xf32> to vector<64x384xf32>
    %11 = arith.addf %9, %10 : vector<64x384xf32>
    %cst = arith.constant 0.000000e+00 : f32
    %12 = vector.broadcast %cst : f32 to vector<64x384xf32>
    %13 = arith.maximumf %11, %12 : vector<64x384xf32>
    %14 = vector.broadcast %0 : vector<64x1xf32> to vector<64x384xf32>
    %15 = arith.mulf %7, %14 : vector<64x384xf32>
    %16 = vector.broadcast %1 : vector<64x1xf32> to vector<64x384xf32>
    %17 = arith.addf %15, %16 : vector<64x384xf32>
    %cst_10 = arith.constant 0.000000e+00 : f32
    %18 = vector.broadcast %cst_10 : f32 to vector<64x384xf32>
    %19 = arith.maximumf %17, %18 : vector<64x384xf32>
    %20 = arith.addf %13, %19 : vector<64x384xf32>
    %21 = arith.truncf %20 : vector<64x384xf32> to vector<64x384xbf16>
    %c0_11 = arith.constant 0 : index
    %c0_12 = arith.constant 0 : index
    %22 = vector.load %arg3[%c0_11, %c0_12] : memref<32x64xbf16, #tpu.memory_space<vmem>>, vector<32x64xbf16>
    %cst_13 = arith.constant dense<0.000000e+00> : vector<32x384xf32>
    %23 = tpu.matmul %22, %21, %cst_13 {dimension_numbers = #tpu.dot_dimension_numbers<[1], [0], [0], [1], [0, 0, 1, 1], [], []>} : vector<32x64xbf16>, vector<64x384xbf16>, vector<32x384xf32> -> vector<32x384xf32>
    %c0_14 = arith.constant 0 : index
    %c0_15 = arith.constant 0 : index
    %24 = vector.load %arg4[%c0_14, %c0_15] : memref<32x1xf32, #tpu.memory_space<vmem>>, vector<32x1xf32>
    %25 = vector.broadcast %24 : vector<32x1xf32> to vector<32x384xf32>
    %26 = arith.addf %23, %25 : vector<32x384xf32>
    %c0_16 = arith.constant 0 : index
    %c0_17 = arith.constant 0 : index
    %c0_18 = arith.constant 0 : index
    %27 = vector.load %arg7[%c0_16, %c0_17, %c0_18] : memref<1x32x384xf32, #tpu.memory_space<vmem>>, vector<1x32x384xf32>
    %28 = vector.shape_cast %27 : vector<1x32x384xf32> to vector<32x384xf32>
    %29 = vector.shape_cast %26 : vector<32x384xf32> to vector<1x32x384xf32>
    tpu.vector_store %arg7[%c0_16, %c0_17, %c0_18], %29 {strides = array<i32>} : memref<1x32x384xf32, #tpu.memory_space<vmem>>, vector<1x32x384xf32>,
    return
  }
  func.func @transform_0(%arg0: i32, %arg1: i32) -> (i32, i32, i32, i32) {
    %c0_i32 = arith.constant 0 : i32
    %c0_i32_0 = arith.constant 0 : i32
    %c0_i32_1 = arith.constant 0 : i32
    return %c0_i32, %arg0, %c0_i32_0, %arg1 : i32, i32, i32, i32
  }
  func.func @transform_1(%arg0: i32, %arg1: i32) -> (i32, i32) {
    %c0_i32 = arith.constant 0 : i32
    %c0_i32_0 = arith.constant 0 : i32
    %c0_i32_1 = arith.constant 0 : i32
    return %c0_i32, %c0_i32_0 : i32, i32
  }
  func.func @transform_2(%arg0: i32, %arg1: i32) -> (i32, i32) {
    %c0_i32 = arith.constant 0 : i32
    %c0_i32_0 = arith.constant 0 : i32
    %c0_i32_1 = arith.constant 0 : i32
    return %c0_i32, %c0_i32_0 : i32, i32
  }
  func.func @transform_3(%arg0: i32, %arg1: i32) -> (i32, i32) {
    %c0_i32 = arith.constant 0 : i32
    %c0_i32_0 = arith.constant 0 : i32
    %c0_i32_1 = arith.constant 0 : i32
    return %c0_i32, %c0_i32_0 : i32, i32
  }
  func.func @transform_4(%arg0: i32, %arg1: i32) -> (i32, i32) {
    %c0_i32 = arith.constant 0 : i32
    %c0_i32_0 = arith.constant 0 : i32
    %c0_i32_1 = arith.constant 0 : i32
    return %c0_i32, %c0_i32_0 : i32, i32
  }
  func.func @transform_5(%arg0: i32, %arg1: i32) -> (i32, i32, i32) {
    %c0_i32 = arith.constant 0 : i32
    %c0_i32_0 = arith.constant 0 : i32
    return %arg0, %c0_i32, %arg1 : i32, i32, i32
  }
}

</mosaic_0001>

<bundles_post_ra>
// kernel: tpu_custom_call.1
= control target key start
LH: loop header
LB: loop body
LE: loop exit
PB: predicated region body
PF: predicated region fallthrough
CT: control target
= control target key end

     0   :  { %10 = vsyncpa [#allocation3], 0  ;;  %s1658_s0 = inlined_call_operand.hbm [shape: bf16[2,2,64,384], index: 0, kind: input, shape index: {}]   ;;  %s1659_s1 = inlined_call_operand.vmem [shape: bf16[32,64], index: 1, kind: input, shape index: {}]   ;;  %s1660_s2 = inlined_call_operand.vmem [shape: f32[32,1], index: 2, kind: input, shape index: {}]   ;;  %s1661_s3 = inlined_call_operand.vmem [shape: f32[64,1], index: 3, kind: input, shape index: {}]   ;;  %s1662_s4 = inlined_call_operand.vmem [shape: f32[64,1], index: 4, kind: input, shape index: {}]   ;;  %s1663_s5 = inlined_call_operand.hbm [shape: f32[2,32,384], index: 5, kind: output, shape index: {}]  }
   0x1   :  { %12 = vsyncpa [#allocation3 + $0x1], 0 }
   0x2   :  { %13 = vsyncpa [#allocation4], 0 }
   0x3   :  { %15 = vsyncpa [#allocation4 + $0x1], 0  ;;  %s1163_s18 = smov 0   ;;  %s1165_s19 = smov 0  }
   0x4   :  { %s1167_s20 = smov 0   ;;  %s1169_s21 = smov 0  }
   0x5   :  { %s1171_s22 = smov 0   ;;  %s1173_s23 = smov 0  }
   0x6 LB: > { %s908_s24 = sadd.s32 4294967295, %s1121_s23   ;;  %s909_s25 = sadd.s32 4294967294, %s1121_s23   ;;  %s1121_s23 = sphi %s1173_s23, %s21_s23   ;;  %s1117_s22 = sphi %s1171_s22, %s1701_s22   ;;  %s1113_s21 = sphi %s1169_s21, %s1700_s21   ;;  %s1109_s20 = sphi %s1167_s20, %s1699_s20   ;;  %s1105_s19 = sphi %s1165_s19, %s1698_s19   ;;  %s1101_s18 = sphi %s1163_s18, %s1697_s18  }
   0x7   : > { %s33_s26 = sadd.s32 1, %s1117_s22  ;;  %s42_s27 = sadd.s32 1, %s1109_s20 }
   0x8   : > { %p35_p0 = scmp.ge.s32.totalorder %s33_s26, 2  ;;  %p49_p1 = scmp.ne.s32.totalorder %s1109_s20, %s1105_s19 }
   0x9   : > { %p50_p2 = scmp.eq.s32.totalorder %s1121_s23, 0  ;;  %p55_p3 = scmp.ne.s32.totalorder %s1105_s19, %s1101_s18 }
   0xa   : > { %s1703_s26 = smov (%p35_p0, %s33_s26), 0  ;;  %p56_p5 = scmp.eq.s32.totalorder %s908_s24, 0 }
   0xb   : > { %1666 = sst [smem:[#allocation11_spill]] %s1703_s26  ;;  %p1204_p4 = por %p50_p2, %p49_p1 }
   0xc   : > { %s37_s29 = ssub.s32 %s1117_s22, %s1703_s26  ;;  %p165_p6 = scmp.eq.s32.totalorder %s908_s24, 1 }
   0xd   : > { %p40_p7 = scmp.eq.s32.totalorder %s37_s29, 0  ;;  %p1210_p8 = por %p56_p5, %p55_p3 }
   0xe   : > { %p1214_p9 = por %p165_p6, %p49_p1  ;;  %p171_p10 = scmp.eq.s32.totalorder %s909_s25, 1 }
   0xf   : > { %s1219_s7 = scalar_select %p40_p7, %s1109_s20, %s42_s27  }
  0x10   : > { %p1221_p11 = por %p171_p10, %p55_p3  ;;  %p911_p12 = scmp.ge.s32.totalorder %s1121_s23, 2 }
  0x12   : > { %199 = sbr.rel (%p911_p12) target bundleno = 37 (0x25), region = 32 }
  0x17   : > { %s203_s9 = sand.u32 1, %s1109_s20   ;;  %s960_s10 = smul.u32 1536, %s1117_s22 }
  0x18   : > { %s959_s11 = smul.u32 192, %s203_s9  ;;  %s1123_s12 = smov 3072  }
  0x19   : > { %965 = sst [smem:[#allocation7]] (%p1204_p4), %s1123_s12  ;;  %s215_s16 = scalar_lea.hbm %s1658_s0, %s960_s10 }
  0x1a   : > { %s964_s13 = scalar_select %p1204_p4, [#allocation0], [#allocation8] }
  0x1b   : > { %s207_s24 = scalar_lea.vmem [#allocation2], %s959_s11  ;;  %s1124_s27 = smov 1536  }
  0x1c   : > { %s220_s17 = sld [smem:[%s964_s13]]   ;;  %s228_s25 = sshll.u32 %s207_s24, 4  ;;  %s229_s25 = int_to_ptr.vmem [resolvable:$true] %s228_s25 }
  0x1d   : > { %966 = sst [smem:[#allocation7 + $0x1]] (%p1204_p4), %s1124_s27  ;;  %s1125_s29 = smov 8  }
  0x1e   : > { %967 = sst [smem:[#allocation7 + $0x2]] (%p1204_p4), %s1125_s29  ;;  %s1126_s26 = smov 192  }
  0x1f   : > { %968 = sst [smem:[#allocation7 + $0x3]] (%p1204_p4), %s1126_s26  ;;  %s1127_s12 = smov 12  }
  0x20   : > { %969 = sst [smem:[#allocation7 + $0x4]] (%p1204_p4), %s1126_s26  ;;  %s204_s11 = scalar_lea.sflag [#allocation3], %s203_s9 }
  0x21   : > { %970 = sst [smem:[#allocation7 + $0x5]] (%p1204_p4), %s1127_s12  ;;  %s1128_s14 = smov 131072  }
  0x22   : > { %s913_s10 = sshll.u32 %s220_s17, 26 }
  0x23   : > { %s914_s13 = sadd.s32 134217728, %s913_s10 }
  0x24   : > { %971 = dma.general (%p1204_p4), %s215_s16, 3072, %s229_s25, %s204_s11, %s1128_s14, [#allocation7], %s914_s13, 0  }
  0x25 PF: > { %p915_p13 = scmp.ge.s32.totalorder %s1121_s23, 1  ;;  %p249_p0 = scmp.lt.s32.totalorder %s1121_s23, 3 }
  0x27   : > { %p250_p1 = pnand %p915_p13, %p249_p0 }
  0x28   : > { %s1252_s15 = sand.u32 (!%p250_p1), 1, %s1105_s19  }
  0x29   : > { %253 = sbr.rel (%p250_p1) target bundleno = 458 (0x1ca), region = 40  ;;  %s256_s17 = scalar_lea.sflag (!%p250_p1), [#allocation3], %s1252_s15 }
  0x2a   : > { %s961_s26 = smul.u32 (!%p250_p1), 192, %s1252_s15 }
  0x2c   : > { %s1256_s24 = scalar_lea.vmem (!%p250_p1), [#allocation2], %s961_s26 }
  0x2e   : > { %1092 = dma.done.wait (%p1210_p8), %s256_s17, 3072  }
  0x2f   : > { %1094 = vsyncadd (%p1210_p8), %s256_s17, 4294964224  ;;  %v1665_v0 = vmov 0   ;;  %v303_v1 = vld [vmem:[%s1662_s4 + $0x30] sm:$0xff]  ;;  %v304_v3 = vld [vmem:[%s1662_s4 + $0x38] sm:$0xff]  ;;  %vm684_vm0 = vcmask 523264   ;;  %s962_s9 = smul.u32 96, %s1252_s15 }
  0x30   : > { %1038 = vset.pattern.permute.xlu1 %v1665_v0  ;;  %1037 = vset.pattern.permute.xlu0 %v1665_v0  ;;  %v295_v2 = vld [vmem:[%s1661_s3 + $0x30] sm:$0xff]  ;;  %v296_v4 = vld [vmem:[%s1661_s3 + $0x38] sm:$0xff]  ;;  %v294_v5 = vld [vmem:[%s1661_s3 + $0x28] sm:$0xff]  ;;  %s963_s25 = smul.u32 1536, %s1113_s21  ;;  %s806_s21 = scalar_lea.sflag [#allocation4], %s1252_s15 }
  0x31   : > { %723 = vmatprep.mubr.bf16.mxu0 %v1665_v0  ;;  %482 = vperm.xlu1 %1038, %v303_v1   ;;  %v293_v6 = vld [vmem:[%s1661_s3 + $0x20] sm:$0xff]  ;;  %v302_v7 = vld [vmem:[%s1662_s4 + $0x28] sm:$0xff]  ;;  %v292_v9 = vld [vmem:[%s1661_s3 + $0x18] sm:$0xff]  ;;  %s1589_s16 = scalar_lea.vmem [#allocation5], %s962_s9  ;;  %s1130_s13 = smov [#allocation5]  }
  0x32   : > { %418 = vperm.xlu0 %1037, %v295_v2   ;;  %v301_v8 = vld [vmem:[%s1662_s4 + $0x20] sm:$0xff]  ;;  %v291_v10 = vld [vmem:[%s1661_s3 + $0x10] sm:$0xff]  ;;  %v300_v11 = vld [vmem:[%s1662_s4 + $0x18] sm:$0xff]  ;;  %s821_s27 = sshll.u32 %s1589_s16, 4  ;;  %s1606_s12 = scalar_lea.hbm %s1663_s5, %s963_s25  ;;  %s1609_s27 = int_to_ptr.vmem [resolvable:$true] %s821_s27 }
  0x33   : > { %v299_v12 = vld [vmem:[%s1662_s4 + $0x10] sm:$0xff]  ;;  %v290_v13 = vld [vmem:[%s1661_s3 + $0x8] sm:$0xff]  ;;  %v289_v14 = vld [vmem:[%s1661_s3] sm:$0xff]  ;;  %s1041_s10 = scalar_lea.vmem %s1609_s27, 1536  ;;  %s1045_s11 = sshll.u32 %s1130_s13, 4  ;;  %s1046_s11 = int_to_ptr.vmem [resolvable:$false] %s1045_s11 }
  0x34   : > { %v298_v15 = vld [vmem:[%s1662_s4 + $0x8] sm:$0xff]  ;;  %v297_v16 = vld [vmem:[%s1662_s4] sm:$0xff]  ;;  %v653_v19 = vld [vmem:[%s1660_s2 + $0x18] sm:$0xff]  ;;  %p1042_p2 = scmp.ne.s32.totalorder %s1609_s27, %s1041_s10  ;;  %s1047_s14 = scalar_lea.vmem %s1046_s11, 3072 }
  0x35   : > { %487 = vperm.xlu1 %1038, %v304_v3   ;;  %v651_v17 = vld [vmem:[%s1660_s2 + $0x8] sm:$0xff]  ;;  %v650_v18 = vld [vmem:[%s1660_s2] sm:$0xff]  ;;  %v652_v20 = vld [vmem:[%s1660_s2 + $0x10] sm:$0xff]  ;;  %p1048_p5 = scmp.lt.s32.totalorder %s1609_s27, %s1046_s11  ;;  %p1049_p6 = scmp.lt.s32.totalorder %s1047_s14, %s1041_s10 }
  0x36   : > { %423 = vperm.xlu0 %1037, %v296_v4   ;;  %v1328_v21 = vld [vmem:[%s1659_s1] sm:$0xff]   ;;  %v1333_v22 = vld [vmem:[%s1256_s24 + $0x48] sm:$0xff]  ;;  %v1336_v23 = vld [vmem:[%s1256_s24 + $0x54] sm:$0xff]  ;;  %p1043_p3 = pnand %p1042_p2, %p1214_p9 }
  0x37   : > { %955 = vmatprep.mubr.msk.bf16.mxu1 %vm684_vm0, %v1328_v21  ;;  %v1339_v24 = vld [vmem:[%s1256_s24 + $0xa8] sm:$0xff]  ;;  %v1342_v25 = vld [vmem:[%s1256_s24 + $0xb4] sm:$0xff]  ;;  %v1345_v26 = vld [vmem:[%s1256_s24 + $0x50] ss:$12 sps:$4 sm:$0xff]   ;;  %v340_v29 = vunpack.c.h.bf16 %v1333_v22  ;;  %v343_v30 = vunpack.c.h.bf16 %v1336_v23  ;;  %v339_v32 = vunpack.c.l.bf16 %v1333_v22  ;;  %v342_v39 = vunpack.c.l.bf16 %v1336_v23  ;;  %p1050_p7 = por %p1049_p6, %p1048_p5 }
  0x38   : > { %v1348_v27 = vld [vmem:[%s1256_s24 + $0xb0] ss:$12 sps:$4 sm:$0xff]   ;;  %v381_v31 = vunpack.c.h.bf16 %v1339_v24  ;;  %v384_v36 = vunpack.c.h.bf16 %v1342_v25  ;;  %v341_v37 = vunpack.c.l.bf16 %v1345_v26  ;;  %v344_v38 = vunpack.c.h.bf16 %v1345_v26  ;;  %v1371_v40 = vld [vmem:[%s1256_s24 + $0x38] ss:$12 sps:$4 sm:$0xff]   ;;  %v1401_v58 = vld [vmem:[%s1256_s24 + $0x20] ss:$12 sps:$4 sm:$0xff]   ;;  %p1044_p4 = pneg %p1043_p3 }
  0x39   : > { %413 = vperm.xlu1 %1038, %v294_v5   ;;  %v1351_v28 = vld [vmem:[%s1256_s24 + $0x30] sm:$0xff]  ;;  %v1358_v33 = vld [vmem:[%s1256_s24 + $0x3c] sm:$0xff]  ;;  %v1374_v41 = vld [vmem:[%s1256_s24 + $0x98] ss:$12 sps:$4 sm:$0xff]   ;;  %v382_v42 = vunpack.c.l.bf16 %v1348_v27  ;;  %v385_v43 = vunpack.c.h.bf16 %v1348_v27  ;;  %v380_v44 = vunpack.c.l.bf16 %v1339_v24  ;;  %v383_v45 = vunpack.c.l.bf16 %v1342_v25 }
  0x3a   : > { %408 = vperm.xlu0 %1037, %v293_v6   ;;  %v1361_v34 = vld [vmem:[%s1256_s24 + $0x90] sm:$0xff]  ;;  %v1364_v35 = vld [vmem:[%s1256_s24 + $0x9c] sm:$0xff]  ;;  %v334_v46 = vunpack.c.h.bf16 %v1351_v28  ;;  %v337_v47 = vunpack.c.h.bf16 %v1358_v33  ;;  %v1388_v51 = vld [vmem:[%s1256_s24 + $0x24] sm:$0xff]  ;;  %v335_v53 = vunpack.c.l.bf16 %v1371_v40  ;;  %v338_v54 = vunpack.c.h.bf16 %v1371_v40  ;;  %p1051_p8 = pnand %p1050_p7, %p1044_p4 }
  0x3b   : > { %v375_v48 = vunpack.c.h.bf16 %v1361_v34  ;;  %v378_v49 = vunpack.c.h.bf16 %v1364_v35  ;;  %v1385_v50 = vld [vmem:[%s1256_s24 + $0x18] sm:$0xff]  ;;  %v376_v55 = vunpack.c.l.bf16 %v1374_v41  ;;  %v379_v56 = vunpack.c.h.bf16 %v1374_v41  ;;  %v1398_v57 = vld [vmem:[%s1256_s24 + $0x84] sm:$0xff]  ;;  %v1404_v59 = vld [vmem:[%s1256_s24 + $0x80] ss:$12 sps:$4 sm:$0xff]  }
  0x3c   : > { %v1391_v52 = vld [vmem:[%s1256_s24 + $0x78] sm:$0xff]  ;;  %v333_v60 = vunpack.c.l.bf16 %v1351_v28  ;;  %v336_v61 = vunpack.c.l.bf16 %v1358_v33  ;;  %v1415_v5 = vld [vmem:[%s1256_s24] sm:$0xff]  ;;  %v1418_v6 = vld [vmem:[%s1256_s24 + $0xc] sm:$0xff]  ;;  %v1671_v41 = vunpack.c.l.bf16 %v1361_v34  ;;  %v1672_v28 = vunpack.c.l.bf16 %v1364_v35 }
  0x3d   : > { %477 = vperm.xlu1 %1038, %v302_v7   ;;  %v1421_v7 = vld [vmem:[%s1256_s24 + $0x60] sm:$0xff] }
  0x3e   : > { %472 = vperm.xlu0 %1037, %v301_v8  }
  0x41   : > { %403 = vperm.xlu1 %1038, %v292_v9  }
  0x42   : > { %398 = vperm.xlu0 %1037, %v291_v10   ;;  %v324_v10 = vunpack.c.l.bf16 %v1418_v6 }
  0x45   : > { %467 = vperm.xlu1 %1038, %v300_v11  }
  0x46   : > { %462 = vperm.xlu0 %1037, %v299_v12   ;;  %v1428_v12 = vld [vmem:[%s1256_s24 + $0x6c] sm:$0xff] }
  0x49   : > { %393 = vperm.xlu1 %1038, %v290_v13   ;;  %v1431_v13 = vld [vmem:[%s1256_s24 + $0x8] ss:$12 sps:$4 sm:$0xff]  }
  0x4a   : > { %388 = vperm.xlu0 %1037, %v289_v14   ;;  %v1434_v14 = vld [vmem:[%s1256_s24 + $0x68] ss:$12 sps:$4 sm:$0xff]  }
  0x4b   : > { %v367_v8 = vunpack.c.h.bf16 %v1434_v14 }
  0x4d   : > { %457 = vperm.xlu1 %1038, %v298_v15  }
  0x4e   : > { %452 = vperm.xlu0 %1037, %v297_v16  }
  0x51   : > { %661 = vperm.xlu1 %1038, %v651_v17  }
  0x52   : > { %656 = vperm.xlu0 %1037, %v650_v18  }
  0x55   : > { %671 = vperm.xlu1 %1038, %v653_v19  }
  0x56   : > { %666 = vperm.xlu0 %1037, %v652_v20  }
  0xac   : > { %v483_v4 = vpop.permute.xlu1 %482 }
  0xad   : > { %v419_v11 = vpop.permute.xlu0 %418 }
  0xae   : > { %v445_v18 = vmul.f32 %v419_v11, %v340_v29  ;;  %v557_v19 = vmul.f32 %v419_v11, %v381_v31  ;;  %v446_v9 = vmul.f32 %v419_v11, %v341_v37  ;;  %v558_v20 = vmul.f32 %v419_v11, %v382_v42 }
  0xaf   : > { %v444_v24 = vmul.f32 %v419_v11, %v339_v32  ;;  %v556_v0 = vmul.f32 %v419_v11, %v380_v44 }
  0xb0   : > { %v509_v3 = vadd.f32 %v483_v4, %v445_v18  ;;  %v581_v15 = vadd.f32 %v557_v19, %v483_v4  ;;  %v510_v2 = vadd.f32 %v483_v4, %v446_v9  ;;  %v582_v16 = vadd.f32 %v558_v20, %v483_v4  ;;  %v488_v1 = vpop.permute.xlu1 %487 }
  0xb1   : > { %v424_v17 = vpop.permute.xlu0 %423  ;;  %v508_v63 = vadd.f32 %v483_v4, %v444_v24  ;;  %v580_v62 = vadd.f32 %v556_v0, %v483_v4 }
  0xb2   : > { %v448_v22 = vmul.f32 %v424_v17, %v343_v30  ;;  %v533_v32 = vmax.f32 %v509_v3, 0.0  ;;  %v560_v37 = vmul.f32 %v424_v17, %v384_v36  ;;  %v605_v42 = vmax.f32 %v581_v15, 0.0 }
  0xb3   : > { %v449_v44 = vmul.f32 %v424_v17, %v344_v38  ;;  %v534_v9 = vmax.f32 %v510_v2, 0.0  ;;  %v561_v11 = vmul.f32 %v424_v17, %v385_v43  ;;  %v606_v0 = vmax.f32 %v582_v16, 0.0 }
  0xb4   : > { %v512_v4 = vadd.f32 %v488_v1, %v448_v22  ;;  %v584_v18 = vadd.f32 %v560_v37, %v488_v1  ;;  %v629_v19 = vadd.f32 %v605_v42, %v533_v32  ;;  %v447_v20 = vmul.f32 %v424_v17, %v342_v39  ;;  %v414_v30 = vpop.permute.xlu1 %413 }
  0xb5   : > { %v409_v3 = vpop.permute.xlu0 %408  ;;  %v513_v24 = vadd.f32 %v488_v1, %v449_v44  ;;  %v585_v31 = vadd.f32 %v561_v11, %v488_v1  ;;  %v630_v36 = vadd.f32 %v606_v0, %v534_v9  ;;  %v532_v15 = vmax.f32 %v508_v63, 0.0 }
  0xb6   : > { %v536_v29 = vmax.f32 %v512_v4, 0.0  ;;  %v608_v26 = vmax.f32 %v584_v18, 0.0  ;;  %v511_v38 = vadd.f32 %v488_v1, %v447_v20  ;;  %v559_v27 = vmul.f32 %v424_v17, %v383_v45 }
  0xb7   : > { %v537_v43 = vmax.f32 %v513_v24, 0.0  ;;  %v609_v2 = vmax.f32 %v585_v31, 0.0  ;;  %v604_v16 = vmax.f32 %v580_v62, 0.0  ;;  %v439_v22 = vmul.f32 %v409_v3, %v334_v46 }
  0xb8   : > { %v632_v23 = vadd.f32 %v608_v26, %v536_v29  ;;  %v535_v39 = vmax.f32 %v511_v38, 0.0  ;;  %v583_v32 = vadd.f32 %v559_v27, %v488_v1  ;;  %v442_v37 = vmul.f32 %v414_v30, %v337_v47  ;;  %v478_v42 = vpop.permute.xlu1 %477 }
  0xb9   : > { %v473_v63 = vpop.permute.xlu0 %472  ;;  %v633_v44 = vadd.f32 %v609_v2, %v537_v43  ;;  %v628_v9 = vadd.f32 %v604_v16, %v532_v15  ;;  %v551_v25 = vmul.f32 %v409_v3, %v375_v48  ;;  %v554_v45 = vmul.f32 %v414_v30, %v378_v49 }
  0xba   : > { %v644_v62 = vpack.c.bf16 %v632_v23, %v629_v19  ;;  %v607_v17 = vmax.f32 %v583_v32, 0.0  ;;  %v503_v31 = vadd.f32 %v473_v63, %v439_v22  ;;  %v506_v46 = vadd.f32 %v478_v42, %v442_v37 }
  0xbb   : > { %v645_v29 = vpack.c.bf16 %v633_v44, %v630_v36  ;;  %v575_v11 = vadd.f32 %v551_v25, %v473_v63  ;;  %v578_v1 = vadd.f32 %v554_v45, %v478_v42  ;;  %v440_v47 = vmul.f32 %v409_v3, %v335_v53 }
  0xbc   : > { %699 = vmatprep.subr.bf16.mxu0 %v644_v62  ;;  %v631_v0 = vadd.f32 %v607_v17, %v535_v39  ;;  %v527_v4 = vmax.f32 %v503_v31, 0.0  ;;  %v530_v18 = vmax.f32 %v506_v46, 0.0  ;;  %v443_v48 = vmul.f32 %v414_v30, %v338_v54  ;;  %v1480_v20 = vpop.permute.xlu1 %403 }
  0xbd   : > { %947 = vmatprep.subr.bf16.mxu1 %v645_v29  ;;  %v1482_v49 = vpop.permute.xlu0 %398  ;;  %v599_v19 = vmax.f32 %v575_v11, 0.0  ;;  %v602_v24 = vmax.f32 %v578_v1, 0.0  ;;  %v504_v36 = vadd.f32 %v473_v63, %v440_v47  ;;  %v552_v15 = vmul.f32 %v409_v3, %v376_v55 }
  0xbe   : > { %v643_v26 = vpack.c.bf16 %v631_v0, %v628_v9  ;;  %948 = vmatpush3.bf16.msra.mxu1 %v645_v29  ;;  %v507_v53 = vadd.f32 %v478_v42, %v443_v48  ;;  %v555_v38 = vmul.f32 %v414_v30, %v379_v56  ;;  %v438_v40 = vmul.f32 %v409_v3, %v333_v60 }
  0xbf   : > { %v623_v54 = vadd.f32 %v599_v19, %v527_v4  ;;  %v626_v27 = vadd.f32 %v602_v24, %v530_v18  ;;  %v528_v43 = vmax.f32 %v504_v36, 0.0  ;;  %v576_v2 = vadd.f32 %v552_v15, %v473_v63 }
  0xc0   : > { %700 = vmatpush1.bf16.msra.mxu0 %v643_v26  ;;  %v531_v16 = vmax.f32 %v507_v53, 0.0  ;;  %v579_v22 = vadd.f32 %v555_v38, %v478_v42  ;;  %v441_v23 = vmul.f32 %v414_v30, %v336_v61  ;;  %v502_v55 = vadd.f32 %v473_v63, %v438_v40  ;;  %v468_v44 = vpop.permute.xlu1 %467 }
  0xc1   : > { %v1492_v39 = vpop.permute.xlu0 %462  ;;  %v641_v32 = vpack.c.bf16 %v626_v27, %v623_v54  ;;  %v600_v37 = vmax.f32 %v576_v2, 0.0  ;;  %v550_v56 = vmul.f32 %v409_v3, %v1671_v41  ;;  %v553_v60 = vmul.f32 %v414_v30, %v1672_v28 }
  0xc2   : > { %v603_v9 = vmax.f32 %v579_v22, 0.0  ;;  %v505_v25 = vadd.f32 %v478_v42, %v441_v23  ;;  %v526_v45 = vmax.f32 %v502_v55, 0.0  ;;  %v1673_v62 = vunpack.c.h.bf16 %v1385_v50 }
  0xc3   : > { %701 = vmatprep.subr.bf16.mxu0 %v641_v32  ;;  %v624_v61 = vadd.f32 %v600_v37, %v528_v43  ;;  %v574_v17 = vadd.f32 %v550_v56, %v473_v63  ;;  %v577_v31 = vadd.f32 %v553_v60, %v478_v42  ;;  %v1674_v46 = vunpack.c.h.bf16 %v1388_v51 }
  0xc4   : > { %v433_v33 = vmul.f32 %v1482_v49, %v1673_v62  ;;  %v627_v3 = vadd.f32 %v603_v9, %v531_v16  ;;  %v529_v29 = vmax.f32 %v505_v25, 0.0  ;;  %v1675_v30 = vunpack.c.h.bf16 %v1391_v52  ;;  %v1517_v40 = vpop.permute.xlu1 %393 }
  0xc5   : > { %v436_v34 = vmul.f32 %v1480_v20, %v1674_v46  ;;  %v598_v1 = vmax.f32 %v574_v17, 0.0  ;;  %v601_v47 = vmax.f32 %v577_v31, 0.0  ;;  %v1676_v4 = vunpack.c.h.bf16 %v1398_v57  ;;  %v1515_v26 = vpop.permute.xlu0 %388 }
  0xc6   : > { %v497_v35 = vadd.f32 %v1492_v39, %v433_v33  ;;  %v545_v11 = vmul.f32 %v1482_v49, %v1675_v30  ;;  %v642_v42 = vpack.c.bf16 %v627_v3, %v624_v61  ;;  %v1677_v19 = vunpack.c.l.bf16 %v1401_v58 }
  0xc7   : > { %v500_v0 = vadd.f32 %v468_v44, %v436_v34  ;;  %v548_v63 = vmul.f32 %v1480_v20, %v1676_v4  ;;  %v622_v36 = vadd.f32 %v598_v1, %v526_v45  ;;  %v625_v15 = vadd.f32 %v601_v47, %v529_v29 }
  0xc8   : > { %v521_v18 = vmax.f32 %v497_v35, 0.0  ;;  %v569_v48 = vadd.f32 %v545_v11, %v1492_v39  ;;  %v434_v24 = vmul.f32 %v1482_v49, %v1677_v19  ;;  %949 = vmatprep.subr.bf16.mxu1 %v642_v42  ;;  %v1678_v27 = vunpack.c.h.bf16 %v1401_v58 }
  0xc9   : > { %v524_v53 = vmax.f32 %v500_v0, 0.0  ;;  %v572_v38 = vadd.f32 %v548_v63, %v468_v44  ;;  %v1679_v16 = vunpack.c.l.bf16 %v1404_v59  ;;  %v640_v23 = vpack.c.bf16 %v625_v15, %v622_v36  ;;  %950 = vmatpush3.bf16.msra.mxu1 %v642_v42  ;;  %v453_v3 = vpop.permute.xlu0 %452 }
  0xca   : > { %v593_v54 = vmax.f32 %v569_v48, 0.0  ;;  %v437_v43 = vmul.f32 %v1480_v20, %v1678_v27  ;;  %v498_v2 = vadd.f32 %v1492_v39, %v434_v24  ;;  %v1680_v32 = vunpack.c.h.bf16 %v1404_v59 }
  0xcb   : > { %v546_v22 = vmul.f32 %v1482_v49, %v1679_v16  ;;  %v596_v55 = vmax.f32 %v572_v38, 0.0  ;;  %v1681_v41 = vunpack.c.l.bf16 %v1385_v50  ;;  %702 = vmatpush1.bf16.msra.mxu0 %v640_v23  ;;  %v1682_v62 = vunpack.c.l.bf16 %v1388_v51  ;;  %v458_v51 = vpop.permute.xlu1 %457 }
  0xcc   : > { %v549_v37 = vmul.f32 %v1480_v20, %v1680_v32  ;;  %v617_v58 = vadd.f32 %v593_v54, %v521_v18  ;;  %v501_v28 = vadd.f32 %v468_v44, %v437_v43  ;;  %v522_v60 = vmax.f32 %v498_v2, 0.0 }
  0xcd   : > { %v432_v56 = vmul.f32 %v1482_v49, %v1681_v41  ;;  %v570_v9 = vadd.f32 %v546_v22, %v1492_v39  ;;  %v620_v25 = vadd.f32 %v596_v55, %v524_v53  ;;  %v435_v33 = vmul.f32 %v1480_v20, %v1682_v62 }
  0xce   : > { %v573_v45 = vadd.f32 %v549_v37, %v468_v44  ;;  %v525_v61 = vmax.f32 %v501_v28, 0.0  ;;  %v1683_v50 = vunpack.c.l.bf16 %v1391_v52  ;;  %v1684_v46 = vunpack.c.l.bf16 %v1398_v57 }
  0xcf   : > { %v496_v59 = vadd.f32 %v1492_v39, %v432_v56  ;;  %v594_v17 = vmax.f32 %v570_v9, 0.0  ;;  %v638_v29 = vpack.c.bf16 %v620_v25, %v617_v58  ;;  %v499_v30 = vadd.f32 %v468_v44, %v435_v33 }
  0xd0   : > { %v544_v31 = vmul.f32 %v1482_v49, %v1683_v50  ;;  %v547_v34 = vmul.f32 %v1480_v20, %v1684_v46  ;;  %v597_v35 = vmax.f32 %v573_v45, 0.0  ;;  %v1685_v4 = vunpack.c.h.bf16 %v1415_v5 }
  0xd1   : > { %v520_v11 = vmax.f32 %v496_v59, 0.0  ;;  %v618_v1 = vadd.f32 %v594_v17, %v522_v60  ;;  %703 = vmatprep.subr.bf16.mxu0 %v638_v29  ;;  %v523_v63 = vmax.f32 %v499_v30, 0.0  ;;  %v1686_v57 = vunpack.c.h.bf16 %v1418_v6 }
  0xd2   : > { %v568_v47 = vadd.f32 %v544_v31, %v1492_v39  ;;  %v571_v0 = vadd.f32 %v547_v34, %v468_v44  ;;  %v427_v52 = vmul.f32 %v1515_v26, %v1685_v4  ;;  %v621_v49 = vadd.f32 %v597_v35, %v525_v61 }
  0xd3   : > { %v430_v20 = vmul.f32 %v1517_v40, %v1686_v57  ;;  %v1687_v42 = vunpack.c.h.bf16 %v1421_v7  ;;  %v1688_v39 = vunpack.c.h.bf16 %v1428_v12  ;;  %v1689_v38 = vunpack.c.l.bf16 %v1431_v13 }
  0xd4   : > { %v592_v48 = vmax.f32 %v568_v47, 0.0  ;;  %v595_v19 = vmax.f32 %v571_v0, 0.0  ;;  %v491_v24 = vadd.f32 %v453_v3, %v427_v52  ;;  %v639_v36 = vpack.c.bf16 %v621_v49, %v618_v1 }
  0xd5   : > { %v539_v18 = vmul.f32 %v1515_v26, %v1687_v42  ;;  %v542_v44 = vmul.f32 %v1517_v40, %v1688_v39  ;;  %v494_v15 = vadd.f32 %v458_v51, %v430_v20  ;;  %v428_v54 = vmul.f32 %v1515_v26, %v1689_v38 }
  0xd6   : > { %v616_v27 = vadd.f32 %v592_v48, %v520_v11  ;;  %v619_v43 = vadd.f32 %v595_v19, %v523_v63  ;;  %v515_v2 = vmax.f32 %v491_v24, 0.0  ;;  %951 = vmatprep.subr.bf16.mxu1 %v639_v36  ;;  %v1690_v55 = vunpack.c.h.bf16 %v1431_v13  ;;  %v662_v63 = vpop.permute.xlu1 %661 }
  0xd7   : > { %v563_v53 = vadd.f32 %v539_v18, %v453_v3  ;;  %v566_v16 = vadd.f32 %v542_v44, %v458_v51  ;;  %v518_v22 = vmax.f32 %v494_v15, 0.0  ;;  %v492_v37 = vadd.f32 %v453_v3, %v428_v54  ;;  %952 = vmatpush3.bf16.msra.mxu1 %v639_v36 }
  0xd8   : > { %v431_v32 = vmul.f32 %v1517_v40, %v1690_v55  ;;  %v637_v41 = vpack.c.bf16 %v619_v43, %v616_v27  ;;  %v1691_v58 = vunpack.c.l.bf16 %v1434_v14  ;;  %v543_v60 = vmul.f32 %v1517_v40, %v367_v8 }
  0xd9   : > { %v587_v23 = vmax.f32 %v563_v53, 0.0  ;;  %v590_v56 = vmax.f32 %v566_v16, 0.0  ;;  %v516_v45 = vmax.f32 %v492_v37, 0.0  ;;  %v1692_v62 = vunpack.c.l.bf16 %v1415_v5 }
  0xda   : > { %v540_v28 = vmul.f32 %v1515_v26, %v1691_v58  ;;  %v495_v25 = vadd.f32 %v458_v51, %v431_v32  ;;  %704 = vmatpush1.bf16.msra.mxu0 %v637_v41  ;;  %v567_v61 = vadd.f32 %v543_v60, %v458_v51  ;;  %v429_v17 = vmul.f32 %v1517_v40, %v324_v10  ;;  %v672_v19 = vpop.permute.xlu1 %671 }
  0xdb   : > { %v611_v9 = vadd.f32 %v587_v23, %v515_v2  ;;  %v426_v13 = vmul.f32 %v1515_v26, %v1692_v62  ;;  %v614_v33 = vadd.f32 %v590_v56, %v518_v22  ;;  %v1693_v14 = vunpack.c.l.bf16 %v1421_v7 }
  0xdc   : > { %v564_v59 = vadd.f32 %v540_v28, %v453_v3  ;;  %v519_v50 = vmax.f32 %v495_v25, 0.0  ;;  %v1694_v46 = vunpack.c.l.bf16 %v1428_v12  ;;  %v591_v35 = vmax.f32 %v567_v61, 0.0  ;;  %v1040_v12 = vld [vmem:[%s1659_s1 + $0x8] sm:$0xff]  }
  0xdd   : > { %v490_v31 = vadd.f32 %v453_v3, %v426_v13  ;;  %v538_v8 = vmul.f32 %v1515_v26, %v1693_v14  ;;  %v635_v34 = vpack.c.bf16 %v614_v33, %v611_v9  ;;  %v493_v30 = vadd.f32 %v458_v51, %v429_v17 }
  0xde   : > { %v541_v5 = vmul.f32 %v1517_v40, %v1694_v46  ;;  %v588_v29 = vmax.f32 %v564_v59, 0.0  ;;  %v615_v10 = vadd.f32 %v591_v35, %v519_v50 }
  0xdf   : > { %v514_v11 = vmax.f32 %v490_v31, 0.0  ;;  %v562_v1 = vadd.f32 %v538_v8, %v453_v3  ;;  %705 = vmatprep.subr.bf16.mxu0 %v635_v34  ;;  %v517_v0 = vmax.f32 %v493_v30, 0.0  ;;  %v1695_v3 = vmov 0  }
  0xe0   : > { %v565_v47 = vadd.f32 %v541_v5, %v458_v51  ;;  %v612_v6 = vadd.f32 %v588_v29, %v516_v45  ;;  %v657_v51 = vpop.permute.xlu0 %656 }
  0xe1   : > { %v586_v4 = vmax.f32 %v562_v1, 0.0 }
  0xe2   : > { %v589_v7 = vmax.f32 %v565_v47, 0.0  ;;  %v636_v52 = vpack.c.bf16 %v615_v10, %v612_v6 }
  0xe3   : > { %v610_v26 = vadd.f32 %v586_v4, %v514_v11 }
  0xe4   : > { %v613_v49 = vadd.f32 %v589_v7, %v517_v0  ;;  %953 = vmatprep.subr.bf16.mxu1 %v636_v52  ;;  %v667_v57 = vpop.permute.xlu0 %666 }
  0xe5   : > { %954 = vmatpush3.bf16.msra.mxu1 %v636_v52 }
  0xe6   : > { %v634_v40 = vpack.c.bf16 %v613_v49, %v610_v26 }
  0xe8   : > { %706 = vmatpush1.bf16.msra.mxu0 %v634_v40  ;;  %956 = vmatmul.mubr.msk.bf16.vlgmr.msra.gmra.mxu1 %vm684_vm0, %v1040_v12 }
  0xeb   : > { %934 = vmatmul.mubr.msk.bf16.vlgmr.msra.gmra.mxu0 %vm684_vm0, %v1328_v21 }
  0xec   : > { %733 = vmatprep.mubr.bf16.mxu0 %v1695_v3 }
  0xf3   : > { %935 = vmatmul.mubr.msk.bf16.gmra.mxu0 %vm684_vm0, %v1040_v12 }
 0x1a8   : > { %v957_v20 = vpop.f32.mrf.mxu1 }
 0x1a9   : > { %v787_v42 = vadd.f32 %v957_v20, %v667_v57 }
 0x1aa   : > { %v778_v48 = vpop.f32.mrf.mxu1 }
 0x1ab   : > { %v725_v18 = vpop.f32.mrf.mxu0  ;;  %801 = vst [vmem:[%s1589_s16 + $0x40] sm:$0xff] %v787_v42  ;;  %v779_v21 = vadd.f32 %v778_v48, %v657_v51 }
 0x1ac   : > { %v726_v24 = vadd.f32 %v725_v18, %v657_v51  ;;  %v958_v44 = vpop.f32.mrf.mxu1 }
 0x1ad   : > { %v727_v39 = vpop.f32.mrf.mxu0  ;;  %795 = vst [vmem:[%s1589_s16 + $0x10] sm:$0xff] %v779_v21  ;;  %v790_v15 = vadd.f32 %v958_v44, %v672_v19 }
 0x1ae   : > { %793 = vst [vmem:[%s1589_s16] sm:$0xff] %v726_v24  ;;  %v728_v36 = vadd.f32 %v727_v39, %v657_v51  ;;  %v781_v38 = vpop.f32.mrf.mxu1 }
 0x1af   : > { %v729_v53 = vpop.f32.mrf.mxu0  ;;  %804 = vst [vmem:[%s1589_s16 + $0x58] sm:$0xff] %v790_v15  ;;  %v782_v27 = vadd.f32 %v781_v38, %v662_v63 }
 0x1b0   : > { %794 = vst [vmem:[%s1589_s16 + $0x8] sm:$0xff] %v728_v36  ;;  %v730_v54 = vadd.f32 %v729_v53, %v662_v63 }
 0x1b1   : > { %v731_v43 = vpop.f32.mrf.mxu0  ;;  %798 = vst [vmem:[%s1589_s16 + $0x28] sm:$0xff] %v782_v27 }
 0x1b2   : > { %796 = vst [vmem:[%s1589_s16 + $0x18] sm:$0xff] %v730_v54  ;;  %v732_v2 = vadd.f32 %v731_v43, %v662_v63 }
 0x1b3   : > { %v735_v16 = vpop.f32.mrf.mxu0 }
 0x1b4   : > { %797 = vst [vmem:[%s1589_s16 + $0x20] sm:$0xff] %v732_v2  ;;  %v736_v22 = vadd.f32 %v735_v16, %v667_v57 }
 0x1b5   : > { %v737_v23 = vpop.f32.mrf.mxu0 }
 0x1b6   : > { %799 = vst [vmem:[%s1589_s16 + $0x30] sm:$0xff] %v736_v22  ;;  %v738_v55 = vadd.f32 %v737_v23, %v667_v57 }
 0x1b7   : > { %v739_v32 = vpop.f32.mrf.mxu0 }
 0x1b8   : > { %800 = vst [vmem:[%s1589_s16 + $0x38] sm:$0xff] %v738_v55  ;;  %v740_v37 = vadd.f32 %v739_v32, %v672_v19 }
 0x1b9   : > { %v741_v41 = vpop.f32.mrf.mxu0 }
 0x1ba   : > { %802 = vst [vmem:[%s1589_s16 + $0x48] sm:$0xff] %v740_v37  ;;  %v742_v56 = vadd.f32 %v741_v41, %v672_v19 }
 0x1bc   : > { %803 = vst [vmem:[%s1589_s16 + $0x50] sm:$0xff] %v742_v56 }
 0x1bd   : > { %1054 = shalt.err (!%p1051_p8)
}
 0x1be   : > { %s1055_s26 = scalar_lea.hbm %s1606_s12, 1536  ;;  %s1059_s28 = scalar_lea.hbm %s1663_s5, 3072 }
 0x1bf   : > { %p1056_p10 = scmp.ne.s32.totalorder %s1606_s12, %s1055_s26  ;;  %p1060_p1 = scmp.lt.s32.totalorder %s1606_s12, %s1663_s5 }
 0x1c0   : > { %p1061_p2 = scmp.lt.s32.totalorder %s1059_s28, %s1055_s26 }
 0x1c1   : > { %p1057_p13 = pnand %p1056_p10, %p1214_p9 }
 0x1c2   : > { %p1062_p3 = por %p1061_p2, %p1060_p1 }
 0x1c3   : > { %p1058_p0 = pneg %p1057_p13 }
 0x1c5   : > { %p1063_p4 = pnand %p1062_p3, %p1058_p0 }
 0x1c7   : > { %1066 = shalt.err (!%p1063_p4)
}
 0x1c8   : > { %s1131_s25 = smov 384   ;;  %s1132_s30 = smov 24  }
 0x1c9   : > { %973 = dma.vmem_to_hbm [thread:$0]  (%p1214_p9), %s1609_s27, 1536, %s1606_s12, %s806_s21, %s1131_s25, %s1131_s25, %s1132_s30  }
 0x1ca PF: > { %s836_s29 = sand.u32 1, %s1101_s18   ;;  %p976_p5 = pnand %p911_p12, %p1221_p11 }
 0x1cb   : > { %s837_s10 = scalar_lea.sflag [#allocation4], %s836_s29 }
 0x1cc   : > { %p977_p6 = pneg %p976_p5 }
 0x1ce   : > { %1096 = dma.done.wait (%p977_p6), %s837_s10, 1536  }
 0x1cf   : > { %1098 = vsyncadd (%p977_p6), %s837_s10, 4294965760  ;;  %s21_s23 = sadd.s32 1, %s1121_s23   ;;  %s1696_s6 = sld [smem:[#allocation11_spill]] }
 0x1d0   : > { %p18_p7 = scmp.ge.s32.totalorder %s21_s23, 4   ;;  %s1697_s18 = smov %s1105_s19 }
 0x1d1   : > { %s1698_s19 = smov %s1109_s20  ;;  %s1699_s20 = smov %s1219_s7 }
 0x1d2   : > { %s1700_s21 = smov %s1117_s22  ;;  %20 = sbr.rel (!%p18_p7) target bundleno = 6 (0x6), region = 91 }
 0x1d5   : > { %s1701_s22 = smov %s1696_s6 }
 0x1d7   :  { %842 = vsyncpa [#allocation3], 1 }
 0x1d8   :  { %844 = vsyncpa [#allocation3 + $0x1], 1 }
 0x1d9   :  { %845 = vsyncpa [#allocation4], 1 }
 0x1da   :  { %847 = vsyncpa [#allocation4 + $0x1], 1 }

</bundles_post_ra>
